<compile_context>
chip_gen: v5e
topology: v5e:2x2
jax: 0.10.0
libtpu: 0.0.40
codegen_flags: <defaults>
</compile_context>

<pallas_src>
import functools
import math

import jax
import jax.numpy as jnp
from jax import lax
from jax.experimental import pallas as pl
from jax.experimental.pallas import tpu as pltpu

NEG_MAX = -3.4028234663852886e38  # -torch.finfo(torch.float32).max
LN_EPS = 1e-5


# ----------------------------- shared math -----------------------------
def _layernorm(x, g, b):
    mu = jnp.mean(x, axis=-1, keepdims=True)
    var = jnp.mean((x - mu) ** 2, axis=-1, keepdims=True)
    return (x - mu) * lax.rsqrt(var + LN_EPS) * g + b


def _gelu_tanh(x):
    c = math.sqrt(2.0 / math.pi)
    return 0.5 * x * (1.0 + jnp.tanh(c * (x + 0.044715 * x * x * x)))


# --------------------- single-buffer capability probe ---------------------
_SINGLE_BUFFER_OK = None


def _single_buffer_supported():
    """Probe whether pipeline_mode=pl.Buffered(1) is accepted by this JAX."""
    global _SINGLE_BUFFER_OK
    if _SINGLE_BUFFER_OK is None:
        try:
            def _probe(x_ref, o_ref):
                o_ref[...] = x_ref[...] + 1.0

            x = jnp.zeros((8, 128), jnp.float32)
            out = pl.pallas_call(
                _probe,
                out_shape=jax.ShapeDtypeStruct((8, 128), jnp.float32),
                grid=(2,),
                in_specs=[pl.BlockSpec((8, 128), lambda i: (0, 0),
                                       pipeline_mode=pl.Buffered(1))],
                out_specs=pl.BlockSpec((8, 128), lambda i: (0, 0)),
            )(x)
            out = jax.block_until_ready(out)
            _SINGLE_BUFFER_OK = bool(jnp.all(out == 1.0))
        except Exception:
            _SINGLE_BUFFER_OK = False
    return _SINGLE_BUFFER_OK


def _const_spec(shape):
    """BlockSpec for a grid-invariant (weight/bias/LN) operand.

    Single-buffered when supported: these blocks keep the same index across
    the whole grid, so the second pipeline buffer is pure VMEM waste.
    """
    index_map = lambda *_: (0,) * len(shape)
    if _single_buffer_supported():
        return pl.BlockSpec(shape, index_map, pipeline_mode=pl.Buffered(1))
    return pl.BlockSpec(shape, index_map)


# ----------------------------- kernels -----------------------------
def kv_kernel(x_ref, g_ref, b_ref, w_ref, bias_ref, kv_ref):
    """LN1 + fused K|V projection for one (batch, seq-tile) grid point."""
    x = x_ref[0].astype(jnp.float32)                 # (tq, D)
    h1 = _layernorm(x, g_ref[...], b_ref[...])       # f32 statistics
    kv = jnp.dot(h1.astype(jnp.bfloat16), w_ref[...],
                 preferred_element_type=jnp.float32) + bias_ref[...]
    kv_ref[0] = kv.astype(jnp.bfloat16)              # (tq, 2D) lane-dense store


def attn_mlp_kernel(x_ref, pm_ref, *rest, num_heads, prefix_length, ff_tile,
                    tq, tkv, use_custom_mask, apply_final_ln):
    """Flash attention over KV tiles + proj + residual + LN2 + FFN (+final LN)."""
    idx = 0
    if use_custom_mask:
        cm_ref = rest[idx]
        idx += 1
    else:
        cm_ref = None
    (kv_ref, ln1g_ref, ln1b_ref, wq_ref, bq_ref, wproj_ref, bproj_ref,
     ln2g_ref, ln2b_ref, w1_ref, b1_ref, w2_ref, b2_ref) = rest[idx:idx + 13]
    idx += 13
    if apply_final_ln:
        fg_ref, fb_ref = rest[idx], rest[idx + 1]
        idx += 2
    else:
        fg_ref = fb_ref = None
    (out_ref, q_sc, acc_sc, m_sc, l_sc, x1_sc, h2_sc) = rest[idx:]

    qi = pl.program_id(1)
    ki = pl.program_id(2)
    nk = pl.num_programs(2)

    D = x_ref.shape[-1]
    hd = D // num_heads
    scale = hd ** -0.5
    f32, bf16 = jnp.float32, jnp.bfloat16

    # ---- first KV step: recompute Q (LN1 + x @ Wq) and reset softmax state
    @pl.when(ki == 0)
    def _init():
        x = x_ref[0].astype(f32)
        h1 = _layernorm(x, ln1g_ref[...], ln1b_ref[...])
        q = jnp.dot(h1.astype(bf16), wq_ref[...],
                    preferred_element_type=f32) + bq_ref[...]
        q_sc[...] = q.astype(bf16)
        m_sc[...] = jnp.full_like(m_sc, -jnp.inf)
        l_sc[...] = jnp.zeros_like(l_sc)
        acc_sc[...] = jnp.zeros_like(acc_sc)

    # ---- online-softmax attention step against this KV tile
    def _attend():
        pad_row = pm_ref[0] > 0.0                    # (1, tkv) key padding
        if use_custom_mask:
            attend = (cm_ref[...] > 0.0) & pad_row   # (tq, tkv)
        else:
            row = qi * tq + lax.broadcasted_iota(jnp.int32, (tq, tkv), 0)
            col = ki * tkv + lax.broadcasted_iota(jnp.int32, (tq, tkv), 1)
            causal = row >= col
            if prefix_length:
                causal = causal | (col < prefix_length)
            attend = causal & pad_row

        nt = (((1,), (1,)), ((), ()))                # contract last dims: q @ k^T
        for h in range(num_heads):                   # static; results go to scratch
            sl = slice(h * hd, (h + 1) * hd)
            s = lax.dot_general(q_sc[:, sl], kv_ref[0, :, sl], nt,
                                preferred_element_type=f32) * scale
            s = jnp.where(attend, s, NEG_MAX)
            m_old = m_sc[:, h:h + 1]
            m_new = jnp.maximum(m_old, jnp.max(s, axis=-1, keepdims=True))
            alpha = jnp.exp(m_old - m_new)
            p = jnp.exp(s - m_new)
            l_sc[:, h:h + 1] = alpha * l_sc[:, h:h + 1] + jnp.sum(
                p, axis=-1, keepdims=True)
            acc_sc[:, sl] = alpha * acc_sc[:, sl] + jnp.dot(
                p.astype(bf16), kv_ref[0, :, D + h * hd:D + (h + 1) * hd],
                preferred_element_type=f32)
            m_sc[:, h:h + 1] = m_new

    if use_custom_mask:
        _attend()
    else:
        # Skip KV tiles fully above the causal diagonal (and past the prefix).
        # (Degenerate fully-masked query rows then normalize over the visited
        #  keys only instead of all T keys — a pathological case.)
        needed = jnp.maximum((qi + 1) * tq, prefix_length)
        lim = (needed - 1) // tkv
        pl.when(ki <= lim)(_attend)

    # ---- last KV step: normalize, proj, residual, LN2, FFN (+final LN)
    @pl.when(ki == nk - 1)
    def _finalize():
        for h in range(num_heads):
            sl = slice(h * hd, (h + 1) * hd)
            acc_sc[:, sl] = acc_sc[:, sl] * pl.reciprocal(
                l_sc[:, h:h + 1], approx=True)
        attn = jnp.dot(acc_sc[...].astype(bf16), wproj_ref[...],
                       preferred_element_type=f32) + bproj_ref[...]
        x = x_ref[0].astype(f32)
        x1_sc[...] = x + attn                        # dropout_1 == identity
        h2_sc[...] = _layernorm(x1_sc[...], ln2g_ref[...],
                                ln2b_ref[...]).astype(bf16)

        # FFN tiled over the 4D hidden dim; partial sums accumulate into
        # acc_sc (reused) so register pressure stays bounded.
        FF = w1_ref.shape[-1]
        for c in range(FF // ff_tile):               # static chunk loop
            c0, c1 = c * ff_tile, (c + 1) * ff_tile
            zc = jnp.dot(h2_sc[...], w1_ref[:, c0:c1],
                         preferred_element_type=f32) + b1_ref[:, c0:c1]
            gc = _gelu_tanh(zc).astype(bf16)
            contrib = jnp.dot(gc, w2_ref[c0:c1, :], preferred_element_type=f32)
            if c == 0:
                acc_sc[...] = contrib
            else:
                acc_sc[...] = acc_sc[...] + contrib

        y = x1_sc[...] + acc_sc[...] + b2_ref[...]   # dropout_2 == identity
        if apply_final_ln:
            y = _layernorm(y, fg_ref[...], fb_ref[...])
        out_ref[0] = y.astype(out_ref.dtype)


# ----------------------------- tiling choices -----------------------------
def _vmem_budget():
    """(vmem_limit_bytes, small_vmem) derived per chip generation."""
    cap = None
    try:
        cap = int(pltpu.get_tpu_info().vmem_capacity_bytes)
    except Exception:
        cap = None
    if cap is None:
        return 48 * 1024 * 1024, False               # safe on v5e/v6e/v7x
    small = cap <= 96 * 1024 * 1024                  # v7x: 64 MiB
    return min(cap * 3 // 4, 64 * 1024 * 1024), small


def _pick_seq_tile(T, small_vmem):
    prefs = (128, 256) if small_vmem else (256, 128)
    for t in prefs:
        if T >= t and T % t == 0:
            return t
    return T


def _pick_kv_tile(T, small_vmem):
    prefs = (256, 128) if small_vmem else (512, 256, 128)
    for t in prefs:
        if T >= t and T % t == 0:
            return t
    return T


def _pick_ff_tile(FF, small_vmem):
    prefs = (512, 256) if small_vmem else (1024, 512)
    for t in prefs:
        if FF >= t and FF % t == 0:
            return t
    return FF


# ----------------------------- wrappers -----------------------------
def _prep_layer_params(p):
    D = p["ln1g"].shape[0]
    f32, bf16 = jnp.float32, jnp.bfloat16
    wqkv = p["wqkv"].astype(bf16)                    # (D, 3D) = [q | k | v]
    bqkv = p["bqkv"].astype(f32)
    return dict(
        ln1g=p["ln1g"].reshape(1, D).astype(f32),
        ln1b=p["ln1b"].reshape(1, D).astype(f32),
        wq=wqkv[:, :D],
        bq=bqkv[:D].reshape(1, D),
        wkv=wqkv[:, D:],
        bkv=bqkv[D:].reshape(1, 2 * D),
        wproj=p["wproj"].astype(bf16),
        bproj=p["bproj"].reshape(1, D).astype(f32),
        ln2g=p["ln2g"].reshape(1, D).astype(f32),
        ln2b=p["ln2b"].reshape(1, D).astype(f32),
        w1=p["w1"].astype(bf16),
        b1=p["b1"].reshape(1, 4 * D).astype(f32),
        w2=p["w2"].astype(bf16),
        b2=p["b2"].reshape(1, D).astype(f32),
    )


def _kv_call(h, p, tq, vmem_limit):
    B, T, D = h.shape
    nq = T // tq
    x_spec = pl.BlockSpec((1, tq, D), lambda b, i: (b, i, 0))
    kv_spec = pl.BlockSpec((1, tq, 2 * D), lambda b, i: (b, i, 0))
    return pl.pallas_call(
        kv_kernel,
        out_shape=jax.ShapeDtypeStruct((B, T, 2 * D), jnp.bfloat16),
        grid=(B, nq),
        in_specs=[x_spec,
                  _const_spec((1, D)), _const_spec((1, D)),
                  _const_spec((D, 2 * D)), _const_spec((1, 2 * D))],
        out_specs=kv_spec,
        compiler_params=pltpu.CompilerParams(
            dimension_semantics=("parallel", "parallel"),
            vmem_limit_bytes=vmem_limit),
    )(h, p["ln1g"], p["ln1b"], p["wkv"], p["bkv"])


def _attn_mlp_call(x, pad3, kv, p, fg, fb, *, num_heads, prefix_length,
                   custom_causal_mask, apply_final_ln, tq, tkv, ff_tile,
                   vmem_limit):
    B, T, D = x.shape
    nq, nk = T // tq, T // tkv
    use_cm = custom_causal_mask is not None

    x_spec = pl.BlockSpec((1, tq, D), lambda b, qi, ki: (b, qi, 0))
    pad_spec = pl.BlockSpec((1, 1, tkv), lambda b, qi, ki: (b, 0, ki))

    if use_cm:
        kv_imap = lambda b, qi, ki: (b, ki, 0)
    else:
        def kv_imap(b, qi, ki):
            # Clamp to the last KV tile actually needed for this q tile
            # (causal + prefix); skipped steps re-see the same index so no
            # DMA is issued for them.
            needed = jnp.maximum((qi + 1) * tq, prefix_length)
            lim = (needed - 1) // tkv
            return (b, jnp.minimum(ki, lim), 0)
    kv_spec = pl.BlockSpec((1, tkv, 2 * D), kv_imap)

    in_specs = [x_spec, pad_spec]
    args = [x, pad3]
    if use_cm:
        in_specs.append(pl.BlockSpec((tq, tkv), lambda b, qi, ki: (qi, ki)))
        args.append(custom_causal_mask)
    in_specs += [kv_spec,
                 _const_spec((1, D)), _const_spec((1, D)),           # ln1 g, b
                 _const_spec((D, D)), _const_spec((1, D)),           # Wq, bq
                 _const_spec((D, D)), _const_spec((1, D)),           # Wproj, bproj
                 _const_spec((1, D)), _const_spec((1, D)),           # ln2 g, b
                 _const_spec((D, 4 * D)), _const_spec((1, 4 * D)),   # fc1 W, b
                 _const_spec((4 * D, D)), _const_spec((1, D))]       # fc2 W, b
    args += [kv, p["ln1g"], p["ln1b"], p["wq"], p["bq"], p["wproj"], p["bproj"],
             p["ln2g"], p["ln2b"], p["w1"], p["b1"], p["w2"], p["b2"]]
    if apply_final_ln:                                # only last layer gets fg/fb
        in_specs += [_const_spec((1, D)), _const_spec((1, D))]
        args += [fg, fb]

    out_dtype = jnp.float32 if apply_final_ln else jnp.bfloat16
    out_spec = pl.BlockSpec((1, tq, D), lambda b, qi, ki: (b, qi, 0))

    kernel = functools.partial(
        attn_mlp_kernel, num_heads=num_heads, prefix_length=prefix_length,
        ff_tile=ff_tile, tq=tq, tkv=tkv, use_custom_mask=use_cm,
        apply_final_ln=apply_final_ln)

    return pl.pallas_call(
        kernel,
        out_shape=jax.ShapeDtypeStruct((B, T, D), out_dtype),
        grid=(B, nq, nk),
        in_specs=in_specs,
        out_specs=out_spec,
        scratch_shapes=[
            pltpu.VMEM((tq, D), jnp.bfloat16),            # q (recomputed)
            pltpu.VMEM((tq, D), jnp.float32),             # attn acc / FFN acc
            pltpu.VMEM((tq, num_heads), jnp.float32),     # online-softmax m
            pltpu.VMEM((tq, num_heads), jnp.float32),     # online-softmax l
            pltpu.VMEM((tq, D), jnp.float32),             # x + attn residual
            pltpu.VMEM((tq, D), jnp.bfloat16),            # LN2 output
        ],
        compiler_params=pltpu.CompilerParams(
            dimension_semantics=("parallel", "parallel", "arbitrary"),
            vmem_limit_bytes=vmem_limit),
    )(*args)


def transformer_forward(h, params, num_heads, mask=None,
                        custom_causal_mask=None, prefix_length=0):
    """Pallas implementation of Transformer.forward (eval mode)."""
    h = h.astype(jnp.float32)
    B, T, D = h.shape
    vmem_limit, small_vmem = _vmem_budget()
    tq = _pick_seq_tile(T, small_vmem)
    tkv = _pick_kv_tile(T, small_vmem)
    ff_tile = _pick_ff_tile(4 * D, small_vmem)

    if mask is not None:
        pad = mask.astype(jnp.float32)
        h = h * pad[:, :, None]                       # glue: input masking
    else:
        pad = jnp.ones((B, T), jnp.float32)
    pad3 = pad.reshape(B, 1, T)
    h = h.astype(jnp.bfloat16)                        # bf16 residual stream

    cm = None
    if custom_causal_mask is not None:
        cm = custom_causal_mask.astype(jnp.float32)
        if prefix_length:
            cm = cm.at[:, :prefix_length].set(1.0)
        cm = cm.astype(jnp.bfloat16)                  # halve mask DMA traffic

    layers = [_prep_layer_params(p) for p in params["layers"]]
    fg = params["fg"].reshape(1, D).astype(jnp.float32)
    fb = params["fb"].reshape(1, D).astype(jnp.float32)

    n = len(layers)
    for li, p in enumerate(layers):
        kvs = _kv_call(h, p, tq, vmem_limit)
        h = _attn_mlp_call(h, pad3, kvs, p, fg, fb,
                           num_heads=num_heads, prefix_length=prefix_length,
                           custom_causal_mask=cm,
                           apply_final_ln=(li == n - 1),
                           tq=tq, tkv=tkv, ff_tile=ff_tile,
                           vmem_limit=vmem_limit)
    return h


# ----------------------------- reference (pure JAX, matched precision) -----
def transformer_reference(h, params, num_heads, mask=None,
                          custom_causal_mask=None, prefix_length=0):
    f32, bf16 = jnp.float32, jnp.bfloat16
    h = h.astype(f32)
    B, T, D = h.shape
    H = num_heads
    hd = D // H
    if custom_causal_mask is None:
        causal = jnp.tril(jnp.ones((T, T), f32))
    else:
        causal = custom_causal_mask.astype(f32)
    if prefix_length:
        causal = causal.at[:, :prefix_length].set(1.0)
    if mask is not None:
        pad = mask.astype(f32)
        h = h * pad[:, :, None]
        amask = pad[:, None, None, :] * causal[None, None]
    else:
        amask = jnp.broadcast_to(causal[None, None], (B, 1, T, T))
    h = h.astype(bf16).astype(f32)                    # bf16 residual stream

    def mm(a, w):    # bf16 operands, f32 accumulation (mirrors the kernel)
        return jnp.dot(a.astype(bf16), w.astype(bf16), preferred_element_type=f32)

    n = len(params["layers"])
    for i, p in enumerate(params["layers"]):
        x = h
        h1 = _layernorm(x, p["ln1g"], p["ln1b"])
        qkv = (mm(h1, p["wqkv"]) + p["bqkv"]).astype(bf16)
        qkv = qkv.reshape(B, T, 3, H, hd)
        q = qkv[:, :, 0].transpose(0, 2, 1, 3)        # (B, H, T, hd)
        k = qkv[:, :, 1].transpose(0, 2, 1, 3)
        v = qkv[:, :, 2].transpose(0, 2, 1, 3)
        s = jnp.einsum("bhqd,bhkd->bhqk", q, k,
                       preferred_element_type=f32) * hd ** -0.5
        s = jnp.where(amask > 0, s, NEG_MAX)
        a = jax.nn.softmax(s, axis=-1)
        o = jnp.einsum("bhqk,bhkd->bhqd", a.astype(bf16), v,
                       preferred_element_type=f32)
        o = o.transpose(0, 2, 1, 3).reshape(B, T, D)
        x = x + mm(o, p["wproj"]) + p["bproj"]
        h2 = _layernorm(x, p["ln2g"], p["ln2b"])
        z = mm(h2, p["w1"]) + p["b1"]
        z = mm(_gelu_tanh(z), p["w2"]) + p["b2"]
        h = x + z
        if i < n - 1:
            h = h.astype(bf16).astype(f32)            # bf16 carry between layers
    return _layernorm(h, params["fg"], params["fb"])


# ----------------------------- parameter init -----------------------------
def _variance_scaling(key, shape_out_in, scale):
    """Truncated-normal fan_in variance scaling (weights returned as [in, out])."""
    out_dim, in_dim = shape_out_in
    std = math.sqrt(scale / in_dim) / 0.87962566103423978
    w = jax.random.truncated_normal(key, -2.0, 2.0, (out_dim, in_dim),
                                    jnp.float32) * std
    return w.T  # [in, out]


def init_params(key, embed_dim, num_layers):
    init_scale = 2.0 / num_layers
    layers = []
    for _ in range(num_layers):
        key, k1, k2, k3, k4 = jax.random.split(key, 5)
        layers.append(dict(
            ln1g=jnp.ones((embed_dim,), jnp.float32),
            ln1b=jnp.zeros((embed_dim,), jnp.float32),
            wqkv=_variance_scaling(k1, (3 * embed_dim, embed_dim), init_scale),
            bqkv=jnp.zeros((3 * embed_dim,), jnp.float32),
            wproj=_variance_scaling(k2, (embed_dim, embed_dim), init_scale),
            bproj=jnp.zeros((embed_dim,), jnp.float32),
            ln2g=jnp.ones((embed_dim,), jnp.float32),
            ln2b=jnp.zeros((embed_dim,), jnp.float32),
            w1=_variance_scaling(k3, (4 * embed_dim, embed_dim), init_scale),
            b1=jnp.zeros((4 * embed_dim,), jnp.float32),
            w2=_variance_scaling(k4, (embed_dim, 4 * embed_dim), init_scale),
            b2=jnp.zeros((embed_dim,), jnp.float32),
        ))
    return dict(layers=layers,
                fg=jnp.ones((embed_dim,), jnp.float32),
                fb=jnp.zeros((embed_dim,), jnp.float32))


# ----------------------------- main -----------------------------
if __name__ == "__main__":
    B, T, D = 2, 8, 32
    NUM_HEADS, NUM_LAYERS = 4, 2

    key = jax.random.PRNGKey(0)
    key, kh, kp = jax.random.split(key, 3)
    h = jax.random.normal(kh, (B, T, D), jnp.float32)
    # padding mask [B, T]: last token of batch 1 is padding
    mask = jnp.ones((B, T), jnp.float32).at[1, -1].set(0.0)
    params = init_params(kp, D, NUM_LAYERS)

    out = transformer_forward(h, params, NUM_HEADS, mask=mask, prefix_length=0)
    out = jax.block_until_ready(out)

    ref = transformer_reference(h, params, NUM_HEADS, mask=mask, prefix_length=0)
    assert out.shape == (B, T, D)
    # Tolerance covers pl.reciprocal(approx=True) in the softmax, bf16 MXU
    # reassociation, bf16 residual carry and the chunked FFN; the reference
    # mirrors the same mixed precision.
    assert jnp.allclose(out, ref, atol=1e-2, rtol=1e-2), (
        float(jnp.max(jnp.abs(out - ref))))
    print("KERNEL_OK")
</pallas_src>

<mosaic_0001>
module attributes {stable_mosaic.version = 11 : i64} {
  func.func @_probe(%arg0: i32, %arg1: memref<8x128xf32, #tpu.memory_space<vmem>>, %arg2: memref<8x128xf32, #tpu.memory_space<vmem>>) attributes {dimension_semantics = [#tpu.dimension_semantics<arbitrary>], iteration_bounds = array<i64: 2>, scalar_prefetch = 0 : i64, scratch_operands = 0 : i64, tpu.core_type = #tpu.core_type<tc>, window_params = [{pipeline_mode = #tpu.pipeline_mode<synchronous>, transform_indices = @transform_0, window_bounds = array<i64: 8, 128>}, {pipeline_mode = #tpu.pipeline_mode<synchronous>, transform_indices = @transform_1, window_bounds = array<i64: 8, 128>}]} {
    %c0 = arith.constant 0 : index
    %c0_0 = arith.constant 0 : index
    %0 = vector.load %arg1[%c0, %c0_0] : memref<8x128xf32, #tpu.memory_space<vmem>>, vector<8x128xf32>
    %cst = arith.constant 1.000000e+00 : f32
    %1 = vector.broadcast %cst : f32 to vector<8x128xf32>
    %2 = arith.addf %0, %1 : vector<8x128xf32>
    %c0_1 = arith.constant 0 : index
    %c0_2 = arith.constant 0 : index
    %3 = vector.load %arg2[%c0_1, %c0_2] : memref<8x128xf32, #tpu.memory_space<vmem>>, vector<8x128xf32>
    tpu.vector_store %arg2[%c0_1, %c0_2], %2 {strides = array<i32>} : memref<8x128xf32, #tpu.memory_space<vmem>>, vector<8x128xf32>,
    return
  }
  func.func @transform_0(%arg0: i32) -> (i32, i32) {
    %c0_i32 = arith.constant 0 : i32
    %c0_i32_0 = arith.constant 0 : i32
    %c0_i32_1 = arith.constant 0 : i32
    return %c0_i32, %c0_i32_0 : i32, i32
  }
  func.func @transform_1(%arg0: i32) -> (i32, i32) {
    %c0_i32 = arith.constant 0 : i32
    %c0_i32_0 = arith.constant 0 : i32
    %c0_i32_1 = arith.constant 0 : i32
    return %c0_i32, %c0_i32_0 : i32, i32
  }
}

module attributes {stable_mosaic.version = 11 : i64} {
  func.func @kv_kernel(%arg0: i32, %arg1: i32, %arg2: memref<1x8x32xbf16, #tpu.memory_space<vmem>>, %arg3: memref<1x32xf32, #tpu.memory_space<vmem>>, %arg4: memref<1x32xf32, #tpu.memory_space<vmem>>, %arg5: memref<32x64xbf16, #tpu.memory_space<vmem>>, %arg6: memref<1x64xf32, #tpu.memory_space<vmem>>, %arg7: memref<1x8x64xbf16, #tpu.memory_space<vmem>>) attributes {dimension_semantics = [#tpu.dimension_semantics<parallel>, #tpu.dimension_semantics<parallel>], iteration_bounds = array<i64: 2, 1>, scalar_prefetch = 0 : i64, scratch_operands = 0 : i64, tpu.core_type = #tpu.core_type<tc>, window_params = [{transform_indices = @transform_0, window_bounds = array<i64: 1, 8, 32>}, {pipeline_mode = #tpu.pipeline_mode<synchronous>, transform_indices = @transform_1, window_bounds = array<i64: 1, 32>}, {pipeline_mode = #tpu.pipeline_mode<synchronous>, transform_indices = @transform_2, window_bounds = array<i64: 1, 32>}, {pipeline_mode = #tpu.pipeline_mode<synchronous>, transform_indices = @transform_3, window_bounds = array<i64: 32, 64>}, {pipeline_mode = #tpu.pipeline_mode<synchronous>, transform_indices = @transform_4, window_bounds = array<i64: 1, 64>}, {transform_indices = @transform_5, window_bounds = array<i64: 1, 8, 64>}]} {
    %c0 = arith.constant 0 : index
    %c0_0 = arith.constant 0 : index
    %c0_1 = arith.constant 0 : index
    %0 = vector.load %arg2[%c0, %c0_0, %c0_1] : memref<1x8x32xbf16, #tpu.memory_space<vmem>>, vector<1x8x32xbf16>
    %1 = vector.shape_cast %0 : vector<1x8x32xbf16> to vector<8x32xbf16>
    %2 = arith.extf %1 : vector<8x32xbf16> to vector<8x32xf32>
    %c0_2 = arith.constant 0 : index
    %c0_3 = arith.constant 0 : index
    %3 = vector.load %arg3[%c0_2, %c0_3] : memref<1x32xf32, #tpu.memory_space<vmem>>, vector<1x32xf32>
    %c0_4 = arith.constant 0 : index
    %c0_5 = arith.constant 0 : index
    %4 = vector.load %arg4[%c0_4, %c0_5] : memref<1x32xf32, #tpu.memory_space<vmem>>, vector<1x32xf32>
    %cst = arith.constant dense<0.000000e+00> : vector<8xf32>
    %5 = vector.multi_reduction <add>, %2, %cst [1] : vector<8x32xf32> to vector<8xf32>
    %6 = vector.shape_cast %5 : vector<8xf32> to vector<8x1xf32>
    %cst_6 = arith.constant 3.200000e+01 : f32
    %7 = vector.broadcast %cst_6 : f32 to vector<8x1xf32>
    %8 = arith.divf %6, %7 : vector<8x1xf32>
    %9 = vector.broadcast %8 : vector<8x1xf32> to vector<8x32xf32>
    %10 = arith.subf %2, %9 : vector<8x32xf32>
    %11 = arith.mulf %10, %10 : vector<8x32xf32>
    %cst_7 = arith.constant dense<0.000000e+00> : vector<8xf32>
    %12 = vector.multi_reduction <add>, %11, %cst_7 [1] : vector<8x32xf32> to vector<8xf32>
    %13 = vector.shape_cast %12 : vector<8xf32> to vector<8x1xf32>
    %cst_8 = arith.constant 3.200000e+01 : f32
    %14 = vector.broadcast %cst_8 : f32 to vector<8x1xf32>
    %15 = arith.divf %13, %14 : vector<8x1xf32>
    %16 = vector.broadcast %8 : vector<8x1xf32> to vector<8x32xf32>
    %17 = arith.subf %2, %16 : vector<8x32xf32>
    %cst_9 = arith.constant 9.99999974E-6 : f32
    %18 = vector.broadcast %cst_9 : f32 to vector<8x1xf32>
    %19 = arith.addf %15, %18 : vector<8x1xf32>
    %20 = math.rsqrt %19 : vector<8x1xf32>
    %21 = vector.broadcast %20 : vector<8x1xf32> to vector<8x32xf32>
    %22 = arith.mulf %17, %21 : vector<8x32xf32>
    %23 = vector.broadcast %3 : vector<1x32xf32> to vector<8x32xf32>
    %24 = arith.mulf %22, %23 : vector<8x32xf32>
    %25 = vector.broadcast %4 : vector<1x32xf32> to vector<8x32xf32>
    %26 = arith.addf %24, %25 : vector<8x32xf32>
    %27 = arith.truncf %26 : vector<8x32xf32> to vector<8x32xbf16>
    %c0_10 = arith.constant 0 : index
    %c0_11 = arith.constant 0 : index
    %28 = vector.load %arg5[%c0_10, %c0_11] : memref<32x64xbf16, #tpu.memory_space<vmem>>, vector<32x64xbf16>
    %cst_12 = arith.constant dense<0.000000e+00> : vector<8x64xf32>
    %29 = tpu.matmul %27, %28, %cst_12 {dimension_numbers = #tpu.dot_dimension_numbers<[1], [0], [0], [1], [0, 0, 1, 1], [], []>} : vector<8x32xbf16>, vector<32x64xbf16>, vector<8x64xf32> -> vector<8x64xf32>
    %c0_13 = arith.constant 0 : index
    %c0_14 = arith.constant 0 : index
    %30 = vector.load %arg6[%c0_13, %c0_14] : memref<1x64xf32, #tpu.memory_space<vmem>>, vector<1x64xf32>
    %31 = vector.broadcast %30 : vector<1x64xf32> to vector<8x64xf32>
    %32 = arith.addf %29, %31 : vector<8x64xf32>
    %33 = arith.truncf %32 : vector<8x64xf32> to vector<8x64xbf16>
    %c0_15 = arith.constant 0 : index
    %c0_16 = arith.constant 0 : index
    %c0_17 = arith.constant 0 : index
    %34 = vector.load %arg7[%c0_15, %c0_16, %c0_17] : memref<1x8x64xbf16, #tpu.memory_space<vmem>>, vector<1x8x64xbf16>
    %35 = vector.shape_cast %34 : vector<1x8x64xbf16> to vector<8x64xbf16>
    %36 = vector.shape_cast %33 : vector<8x64xbf16> to vector<1x8x64xbf16>
    tpu.vector_store %arg7[%c0_15, %c0_16, %c0_17], %36 {strides = array<i32>} : memref<1x8x64xbf16, #tpu.memory_space<vmem>>, vector<1x8x64xbf16>,
    return
  }
  func.func @transform_0(%arg0: i32, %arg1: i32) -> (i32, i32, i32) {
    %c0_i32 = arith.constant 0 : i32
    %c0_i32_0 = arith.constant 0 : i32
    return %arg0, %arg1, %c0_i32 : i32, i32, i32
  }
  func.func @transform_1(%arg0: i32, %arg1: i32) -> (i32, i32) {
    %c0_i32 = arith.constant 0 : i32
    %c0_i32_0 = arith.constant 0 : i32
    %c0_i32_1 = arith.constant 0 : i32
    return %c0_i32, %c0_i32_0 : i32, i32
  }
  func.func @transform_2(%arg0: i32, %arg1: i32) -> (i32, i32) {
    %c0_i32 = arith.constant 0 : i32
    %c0_i32_0 = arith.constant 0 : i32
    %c0_i32_1 = arith.constant 0 : i32
    return %c0_i32, %c0_i32_0 : i32, i32
  }
  func.func @transform_3(%arg0: i32, %arg1: i32) -> (i32, i32) {
    %c0_i32 = arith.constant 0 : i32
    %c0_i32_0 = arith.constant 0 : i32
    %c0_i32_1 = arith.constant 0 : i32
    return %c0_i32, %c0_i32_0 : i32, i32
  }
  func.func @transform_4(%arg0: i32, %arg1: i32) -> (i32, i32) {
    %c0_i32 = arith.constant 0 : i32
    %c0_i32_0 = arith.constant 0 : i32
    %c0_i32_1 = arith.constant 0 : i32
    return %c0_i32, %c0_i32_0 : i32, i32
  }
  func.func @transform_5(%arg0: i32, %arg1: i32) -> (i32, i32, i32) {
    %c0_i32 = arith.constant 0 : i32
    %c0_i32_0 = arith.constant 0 : i32
    return %arg0, %arg1, %c0_i32 : i32, i32, i32
  }
}

</mosaic_0001>

<bundles_post_ra>
// kernel: tpu_custom_call.1
= control target key start
LH: loop header
LB: loop body
LE: loop exit
PB: predicated region body
PF: predicated region fallthrough
CT: control target
= control target key end

     0   :  { %6 = vsyncpa [#allocation3], 0  ;;  %s287_s0 = inlined_call_operand.hbm [shape: f32[8,128], index: 0, kind: input, shape index: {}]   ;;  %s288_s1 = inlined_call_operand.hbm [shape: f32[8,128], index: 1, kind: output, shape index: {}]  }
   0x1   :  { %7 = vsyncpa [#allocation4], 0  ;;  %s270_s6 = smov 0  }
   0x2 LB: > { %s149_s7 = sadd.s32 4294967295, %s256_s6   ;;  %p150_p0 = scmp.ge.s32.totalorder %s256_s6, 1  ;;  %s256_s6 = sphi %s270_s6, %s13_s6  }
   0x3   : > { %p60_p1 = scmp.lt.s32.totalorder %s256_s6, 3  ;;  %s72_s10 = sshll.u32 %s287_s0, 4  ;;  %s73_s10 = int_to_ptr.hbm [resolvable:$true] %s72_s10 }
   0x4   : > { %p170_p3 = scmp.eq.s32.totalorder %s149_s7, 0  ;;  %s258_s11 = smov [#allocation2]  }
   0x5   : > { %p61_p2 = pnand %p150_p0, %p60_p1  ;;  %s74_s12 = sshll.u32 %s258_s11, 4  ;;  %s75_s12 = int_to_ptr.vmem [resolvable:$true] %s74_s12 }
   0x7   : > { %p166_p4 = pneg %p61_p2  ;;  %87 = sbr.rel (%p61_p2) target bundleno = 20 (0x14), region = 24 }
   0x9   : > { %p167_p5 = pnand %p170_p3, %p166_p4 }
   0xb   : > { %169 = dma.hbm_to_vmem [thread:$0]  (!%p167_p5), %s73_s10, 128, %s75_s12, [#allocation3]  }
   0xc   : > { %247 = dma.done.wait (%p170_p3), [#allocation3], 128  }
   0xd   : > { %249 = vsyncadd (%p170_p3), [#allocation3], 4294967168  ;;  %s259_s13 = smov [#allocation5]   ;;  %s109_s17 = sshll.u32 %s288_s1, 4  ;;  %v98_v0 = vld [vmem:[#allocation2] sm:$0xff]  ;;  %s110_s17 = int_to_ptr.hbm [resolvable:$true] %s109_s17 }
   0xe   : > { %s107_s14 = sshll.u32 %s259_s13, 4  ;;  %p172_p6 = scmp.eq.s32.totalorder %s149_s7, 1  ;;  %v99_v1 = vadd.f32 1.0, %v98_v0  ;;  %s108_s14 = int_to_ptr.vmem [resolvable:$true] %s107_s14 }
  0x10   : > { %100 = vst [vmem:[#allocation5] sm:$0xff] %v99_v1 }
  0x11   : > { %163 = dma.vmem_to_hbm [thread:$0]  (%p172_p6), %s108_s14, 128, %s110_s17, [#allocation4]  }
  0x12   : > { %251 = dma.done.wait (%p172_p6), [#allocation4], 128  }
  0x13   : > { %253 = vsyncadd (%p172_p6), [#allocation4], 4294967168 }
  0x14 PF: > { %s13_s6 = sadd.s32 1, %s256_s6  }
  0x15   : > { %p10_p7 = scmp.ge.s32.totalorder %s13_s6, 4  }
  0x17   :  { %12 = sbr.rel (!%p10_p7) target bundleno = 2 (0x2), region = 53 }
  0x1c   :  { %123 = vsyncpa [#allocation3], 1 }
  0x1d   :  { %125 = vsyncpa [#allocation3 + $0x1], 1 }
  0x1e   :  { %126 = vsyncpa [#allocation4], 1 }
  0x1f   :  { %128 = vsyncpa [#allocation4 + $0x1], 1 }

// kernel: tpu_custom_call.1
= control target key start
LH: loop header
LB: loop body
LE: loop exit
PB: predicated region body
PF: predicated region fallthrough
CT: control target
= control target key end

     0   :  { %10 = vsyncpa [#allocation3], 0  ;;  %s982_s0 = inlined_call_operand.hbm [shape: bf16[2,8,32], index: 0, kind: input, shape index: {}]   ;;  %s983_s1 = inlined_call_operand.hbm [shape: f32[1,32], index: 1, kind: input, shape index: {}]   ;;  %s984_s2 = inlined_call_operand.vmem [shape: f32[1,32], index: 2, kind: input, shape index: {}]   ;;  %s985_s3 = inlined_call_operand.hbm [shape: bf16[32,64], index: 3, kind: input, shape index: {}]   ;;  %s986_s4 = inlined_call_operand.vmem [shape: f32[1,64], index: 4, kind: input, shape index: {}]   ;;  %s987_s5 = inlined_call_operand.hbm [shape: bf16[2,8,64], index: 5, kind: output, shape index: {}]  }
   0x1   :  { %12 = vsyncpa [#allocation3 + $0x1], 0 }
   0x2   :  { %13 = vsyncpa [#allocation6], 0 }
   0x3   :  { %14 = vsyncpa [#allocation4], 0 }
   0x4   :  { %16 = vsyncpa [#allocation4 + $0x1], 0  ;;  %s823_s18 = smov 0   ;;  %s825_s19 = smov 0  }
   0x5   :  { %s827_s20 = smov 0   ;;  %s829_s21 = smov 0  }
   0x6   :  { %s831_s22 = smov 0   ;;  %s833_s23 = smov 0  }
   0x7 LB: > { %s489_s24 = sadd.s32 4294967295, %s786_s23   ;;  %s490_s25 = sadd.s32 4294967294, %s786_s23   ;;  %s786_s23 = sphi %s833_s23, %s22_s23   ;;  %s782_s22 = sphi %s831_s22, %s997_s22   ;;  %s778_s21 = sphi %s829_s21, %s996_s21   ;;  %s774_s20 = sphi %s827_s20, %s995_s20   ;;  %s770_s19 = sphi %s825_s19, %s994_s19   ;;  %s766_s18 = sphi %s823_s18, %s993_s18  }
   0x8   : > { %p56_p0 = scmp.ne.s32.totalorder %s770_s19, %s766_s18  ;;  %p859_p1 = scmp.eq.s32.totalorder %s489_s24, 0 }
   0x9   : > { %p172_p2 = scmp.eq.s32.totalorder %s490_s25, 1  ;;  %p491_p4 = scmp.ge.s32.totalorder %s786_s23, 1 }
   0xa   : > { %p865_p3 = por %p859_p1, %p56_p0  ;;  %p179_p6 = scmp.lt.s32.totalorder %s786_s23, 3 }
   0xb   : > { %p870_p5 = por %p172_p2, %p56_p0  ;;  %s191_s6 = sshll.u32 %s983_s1, 4  ;;  %s192_s6 = int_to_ptr.hbm [resolvable:$true] %s191_s6 }
   0xc   : > { %p878_p7 = pnand %p491_p4, %p179_p6  ;;  %p494_p8 = scmp.ge.s32.totalorder %s786_s23, 2 }
   0xd   : > { %s788_s8 = smov [#allocation5]   ;;  %s205_s12 = sshll.u32 %s985_s3, 4  ;;  %s206_s12 = int_to_ptr.hbm [resolvable:$true] %s205_s12 }
   0xe   : > { %p529_p9 = pneg %p878_p7  ;;  %s193_s9 = sshll.u32 %s788_s8, 4  ;;  %s194_s9 = int_to_ptr.vmem [resolvable:$true] %s193_s9 }
   0xf   : > { %s789_s13 = smov [#allocation7]   ;;  %s790_s15 = smov 64  }
  0x10   : > { %p530_p10 = pnand %p529_p9, %p859_p1  ;;  %s207_s14 = sshll.u32 %s789_s13, 4  ;;  %s208_s14 = int_to_ptr.vmem [resolvable:$true] %s207_s14 }
  0x11   : > { %s791_s16 = smov 4   ;;  %p166_p11 = scmp.eq.s32.totalorder %s489_s24, 1 }
  0x12   : > { %532 = dma.hbm_to_vmem [thread:$0]  (!%p530_p10), %s192_s6, 16, %s194_s9, [#allocation6]  }
  0x13   : > { %535 = dma.hbm_to_vmem [thread:$0]  (!%p530_p10), %s206_s12, 256, %s208_s14, [#allocation6], %s790_s15, %s790_s15, %s791_s16  }
  0x14   : > { %s34_s17 = sadd.s32 1, %s782_s22  ;;  %s43_s25 = sadd.s32 1, %s774_s20 }
  0x15   : > { %p36_p12 = scmp.ge.s32.totalorder %s34_s17, 2  ;;  %p50_p13 = scmp.ne.s32.totalorder %s774_s20, %s770_s19 }
  0x16   : > { %p51_p0 = scmp.eq.s32.totalorder %s786_s23, 0  ;;  %p546_p4 = scmp.lt.s32.totalorder %s786_s23, 2 }
  0x17   : > { %s999_s17 = smov (%p36_p12, %s34_s17), 0  ;;  %p899_p2 = por %p166_p11, %p50_p13 }
  0x18   : > { %s38_s30 = ssub.s32 %s782_s22, %s999_s17  ;;  %s224_s6 = sand.u32 1, %s774_s20  }
  0x19   : > { %p41_p6 = scmp.eq.s32.totalorder %s38_s30, 0  ;;  %p52_p9 = por %p51_p0, %p50_p13 }
  0x1a   : > { %s495_s8 = sshll.u32 %s224_s6, 2  ;;  %s496_s24 = sshll.u32 %s782_s22, 2 }
  0x1b   : > { %s909_s9 = scalar_select %p41_p6, %s774_s20, %s43_s25  }
  0x1c   : > { %s233_s12 = scalar_lea.hbm %s982_s0, %s496_s24  ;;  %s228_s14 = scalar_lea.vmem [#allocation2], %s495_s8 }
  0x1d   : > { %s235_s13 = sshll.u32 %s233_s12, 4  ;;  %s237_s15 = sshll.u32 %s228_s14, 4  ;;  %s236_s13 = int_to_ptr.hbm [resolvable:$true] %s235_s13  ;;  %s238_s15 = int_to_ptr.vmem [resolvable:$true] %s237_s15 }
  0x1e   : > { %p537_p10 = pnand %p546_p4, %p52_p9  ;;  %s225_s16 = scalar_lea.sflag [#allocation3], %s224_s6 }
  0x1f   : > { %246 = sbr.rel (%p878_p7) target bundleno = 446 (0x1be), region = 40  ;;  %s919_s25 = sand.u32 (!%p878_p7), 1, %s770_s19  }
  0x20   : > { %539 = dma.hbm_to_vmem [thread:$0]  (!%p537_p10), %s236_s13, 64, %s238_s15, %s225_s16  }
  0x21   : > { %s498_s30 = sshll.u32 (!%p878_p7), %s919_s25, 2  ;;  %s249_s24 = scalar_lea.sflag (!%p878_p7), [#allocation3], %s919_s25 }
  0x22   : > { %s252_s8 = scalar_lea.vmem (!%p878_p7), [#allocation2], %s498_s30 }
  0x24   : > { %753 = dma.done.wait (%p865_p3), %s249_s24, 64  }
  0x25   : > { %755 = vsyncadd (%p865_p3), %s249_s24, 4294967232 }
  0x26   : > { %757 = dma.done.wait (%p859_p1), [#allocation6], 272  }
  0x27   : > { %759 = vsyncadd (%p859_p1), [#allocation6], 4294967024  ;;  %vm295_vm0 = vcmask 261120   ;;  %v291_v0 = vld [vmem:[%s252_s8] sm:$0xf]  ;;  %v792_v3 = vmov 32.0  }
  0x28   : > { %v292_v1 = vunpack.c.l.bf16 %v291_v0  ;;  %606 = vrcp.f32 %v792_v3  ;;  %v516_v15 = vld [vmem:[#allocation7 + $0x8] sm:$0xff]  ;;  %v515_v16 = vld [vmem:[#allocation7] sm:$0xff]  ;;  %v603_v26 = vld [vmem:[#allocation5] ss:$0 sm:$0xff]  ;;  %s512_s7 = sshll.u32 %s778_s21, 2  ;;  %s289_s14 = scalar_lea.vmem [#allocation8], %s498_s30 }
  0x29   : > { %363 = vmatpush.bf16.msra.mxu0 %v516_v15  ;;  %v604_v29 = vld [vmem:[%s984_s2] ss:$0 sm:$0xff]  ;;  %s385_s13 = scalar_lea.hbm %s987_s5, %s512_s7  ;;  %s387_s15 = sshll.u32 %s289_s14, 4  ;;  %vm371_vm5 = vcmask 519168   ;;  %s388_s15 = int_to_ptr.vmem [resolvable:$true] %s387_s15 }
  0x2a   : > { %v296_v2 = vsel %vm295_vm0, %v292_v1, 0.0  ;;  %v605_v33 = vld [vmem:[%s986_s4] ss:$0 sm:$0xff]  ;;  %s389_s16 = sshll.u32 %s385_s13, 4  ;;  %s374_s21 = scalar_lea.sflag [#allocation4], %s919_s25  ;;  %s390_s16 = int_to_ptr.hbm [resolvable:$true] %s389_s16 }
  0x2b   : > { %297 = vadd.xlane.f32.xlu0 %v296_v2  ;;  %s714_s24 = sshra.s32 %s390_s16, 4  ;;  %s720_s30 = scalar_lea.hbm %s987_s5, 8  ;;  %s715_s24 = int_to_ptr.hbm [resolvable:$true] %s714_s24 }
  0x2c   : > { %s716_s8 = scalar_lea.hbm %s715_s24, 4  ;;  %p721_p11 = scmp.lt.s32.totalorder %s715_s24, %s987_s5 }
  0x2d   : > { %364 = vmatpush.bf16.msra.mxu0 %v515_v16  ;;  %p717_p1 = scmp.ne.s32.totalorder %s715_s24, %s716_s8  ;;  %p722_p12 = scmp.lt.s32.totalorder %s720_s30, %s716_s8 }
  0x2e   : > { %v607_v4 = vpop.eup %606 }
  0x2f   : > { %v300_v5 = vmul.f32 32.0, %v607_v4  ;;  %vm304_vm1 = vweird.f32 %v607_v4  ;;  %p718_p3 = pnand %p717_p1, %p899_p2  ;;  %p723_p13 = por %p722_p12, %p721_p11 }
  0x31   : > { %v301_v6 = vsub.f32 1.0, %v300_v5  ;;  %p719_p7 = pneg %p718_p3 }
  0x33   : > { %v302_v7 = vmul.f32 %v607_v4, %v301_v6  ;;  %p724_p0 = pnand %p723_p13, %p719_p7 }
  0x35   : > { %v303_v8 = vadd.f32 %v607_v4, %v302_v7 }
  0x37   : > { %v305_v9 = vsel %vm304_vm1, %v607_v4, %v303_v8 }
  0x9e   : > { %v298_v10 = vpop.xlane.xlu0 %297 }
  0x9f   : > { %v306_v11 = vmul.f32 %v305_v9, %v298_v10 }
  0xa1   : > { %v307_v12 = vsub.f32 %v292_v1, %v306_v11 }
  0xa3   : > { %v308_v13 = vmul.f32 %v307_v12, %v307_v12 }
  0xa5   : > { %v309_v14 = vsel %vm295_vm0, %v308_v13, 0.0 }
  0xa6   : > { %310 = vadd.xlane.f32.xlu0 %v309_v14 }
 0x119   : > { %v311_v17 = vpop.xlane.xlu0 %310 }
 0x11a   : > { %v312_v18 = vmul.f32 %v311_v17, %v305_v9 }
 0x11c   : > { %v313_v19 = vadd.f32 1e-05, %v312_v18 }
 0x11e   : > { %608 = vrsqrt.f32 %v313_v19  ;;  %vm320_vm3 = vweird.f32 %v313_v19 }
 0x124   : > { %v609_v20 = vpop.eup %608 }
 0x125   : > { %v315_v21 = vmul.f32 %v609_v20, %v313_v19  ;;  %vm321_vm2 = vweird.f32 %v609_v20 }
 0x126   : > { %vm322_vm4 = vmor %vm320_vm3, %vm321_vm2 }
 0x127   : > { %v316_v22 = vmul.f32 %v609_v20, %v315_v21 }
 0x129   : > { %v317_v23 = vmul.f32 0.5, %v316_v22 }
 0x12b   : > { %v318_v24 = vsub.f32 1.5, %v317_v23 }
 0x12d   : > { %v319_v25 = vmul.f32 %v609_v20, %v318_v24 }
 0x12f   : > { %v323_v27 = vsel %vm322_vm4, %v609_v20, %v319_v25 }
 0x130   : > { %v324_v28 = vmul.f32 %v323_v27, %v307_v12 }
 0x132   : > { %v328_v30 = vmul.f32 %v603_v26, %v324_v28 }
 0x134   : > { %v332_v31 = vadd.f32 %v604_v29, %v328_v30 }
 0x136   : > { %v333_v32 = vpack.c.bf16 %v332_v31, %v332_v31 }
 0x138   : > { %510 = vmatmul.msk.bf16.vlgmr.msra.gmra.mxu0 %vm295_vm0, %v333_v32 }
 0x1b5   : > { %v366_v34 = vpop.f32.mrf.mxu0 }
 0x1b6   : > { %v367_v35 = vadd.f32 %v605_v33, %v366_v34 }
 0x1b8   : > { %v370_v36 = vpack.c.bf16 %v367_v35, %v367_v35 }
 0x1ba   : > { %372 = vst.msk [vmem:[%s289_s14] sm:$0xf] %vm371_vm5, %v370_v36 }
 0x1bb   : > { %727 = shalt.err (!%p724_p0)
}
 0x1bc   : > { %527 = dma.vmem_to_hbm [thread:$0]  (%p899_p2), %s388_s15, 64, %s390_s16, %s374_s21  }
 0x1bd   : > { %v368_v37 = vpop.f32.mrf.mxu0 }
 0x1be PF: > { %s401_s25 = sand.u32 1, %s766_s18   ;;  %p541_p4 = pnand %p494_p8, %p870_p5 }
 0x1bf   : > { %s402_s10 = scalar_lea.sflag [#allocation4], %s401_s25 }
 0x1c0   : > { %p542_p6 = pneg %p541_p4 }
 0x1c2   : > { %761 = dma.done.wait (%p542_p6), %s402_s10, 64  }
 0x1c3   : > { %763 = vsyncadd (%p542_p6), %s402_s10, 4294967232  ;;  %s22_s23 = sadd.s32 1, %s786_s23   ;;  %s993_s18 = smov %s770_s19 }
 0x1c4   : > { %p19_p9 = scmp.ge.s32.totalorder %s22_s23, 4   ;;  %s994_s19 = smov %s774_s20 }
 0x1c5   : > { %s995_s20 = smov %s909_s9  ;;  %s996_s21 = smov %s782_s22 }
 0x1c6   : > { %s997_s22 = smov %s999_s17  ;;  %21 = sbr.rel (!%p19_p9) target bundleno = 7 (0x7), region = 93 }
 0x1cb   :  { %408 = vsyncpa [#allocation3], 1 }
 0x1cc   :  { %410 = vsyncpa [#allocation3 + $0x1], 1 }
 0x1cd   :  { %411 = vsyncpa [#allocation6], 1 }
 0x1ce   :  { %412 = vsyncpa [#allocation4], 1 }
 0x1cf   :  { %414 = vsyncpa [#allocation4 + $0x1], 1 }

</bundles_post_ra>
